<compile_context>
chip_gen: v7x
topology: tpu7x:2x2x1
jax: 0.10.0
libtpu: 0.0.40
codegen_flags: <defaults>
</compile_context>

<pallas_src>
import math

import jax
import jax.numpy as jnp
from jax import lax
from jax.experimental import pallas as pl
from jax.experimental.pallas import tpu as pltpu


def _erf_f32(x):
    # Abramowitz & Stegun 7.1.26 rational approximation (max abs err ~1.5e-7),
    # built from exp / mul / add / where so it lowers cleanly in Mosaic.
    a1 = 0.254829592
    a2 = -0.284496736
    a3 = 1.421413741
    a4 = -1.453152027
    a5 = 1.061405429
    p = 0.3275911
    ax = jnp.abs(x)
    t = 1.0 / (1.0 + p * ax)
    poly = ((((a5 * t + a4) * t + a3) * t + a2) * t + a1) * t
    y = 1.0 - poly * jnp.exp(-(ax * ax))
    return jnp.where(x >= 0.0, y, -y)


def _gelu_exact_f32(x):
    # Exact (erf-based) GELU, matching torch.nn.functional.gelu default.
    return 0.5 * x * (1.0 + _erf_f32(x * (1.0 / math.sqrt(2.0))))


def _intermediate_kernel(x_ref, w_ref, b_ref, o_ref):
    # x_ref: (bm, H)        row tile of flattened hidden states (input dtype)
    # w_ref: (I or bn, H)   weight tile, nn.Linear layout (out_features, in_features)
    # b_ref: (1,  I or bn)  bias tile
    # o_ref: (bm, I or bn)  lane-dense output tile
    y = lax.dot_general(
        x_ref[...], w_ref[...],
        dimension_numbers=(((1,), (1,)), ((), ())),   # contract along H; no transpose
        preferred_element_type=jnp.float32)
    y = y + b_ref[...].astype(jnp.float32)
    o_ref[...] = _gelu_exact_f32(y).astype(o_ref.dtype)


def clap_text_intermediate(hidden_states, weight, bias, *,
                           block_m=512, block_n=1024,
                           weight_resident_bytes=8 * 1024 * 1024):
    """hidden_states: [B, S, H]; weight: [I, H] (nn.Linear convention); bias: [I].

    Returns GELU(hidden_states @ weight.T + bias): [B, S, I].
    """
    B, S, H = hidden_states.shape
    I, H_w = weight.shape
    assert H_w == H, "weight must be (intermediate_size, hidden_size)"
    M = B * S

    x = hidden_states.reshape(M, H)          # contiguous flatten, no data movement
    b2 = bias.reshape(1, I)

    dtype_bytes = jnp.dtype(weight.dtype).itemsize
    w_bytes = I * H * dtype_bytes

    # Row tile: full extent when small (always legal), otherwise block_m.
    # For moderately large M that still fits a single tile, split into two row
    # tiles so the leading "parallel" axis can shard across v7x's 2 TCs.
    if M <= block_m:
        bm = M
        if M >= 256 and (M % 16) == 0:
            bm = M // 2
    else:
        bm = block_m

    cost = pl.CostEstimate(
        flops=2 * M * H * I,
        transcendentals=M * I,                       # one exp per output element
        bytes_accessed=(M * H + I * H + I + M * I) * dtype_bytes)

    if w_bytes <= weight_resident_bytes:
        # Weight + bias fully resident in VMEM; stream only row tiles of x.
        grid = (pl.cdiv(M, bm),)
        in_specs = [
            pl.BlockSpec((bm, H), lambda i: (i, 0)),     # x rows stream
            pl.BlockSpec((I, H), lambda i: (0, 0)),      # W resident (constant map)
            pl.BlockSpec((1, I), lambda i: (0, 0)),      # bias resident
        ]
        out_specs = pl.BlockSpec((bm, I), lambda i: (i, 0))
        dim_sem = ("parallel",)
    else:
        # Large intermediate: tile over output columns too (weight rows).
        bn = I if I <= block_n else block_n
        grid = (pl.cdiv(M, bm), pl.cdiv(I, bn))
        in_specs = [
            pl.BlockSpec((bm, H), lambda i, j: (i, 0)),
            pl.BlockSpec((bn, H), lambda i, j: (j, 0)),
            pl.BlockSpec((1, bn), lambda i, j: (0, j)),
        ]
        out_specs = pl.BlockSpec((bm, bn), lambda i, j: (i, j))
        dim_sem = ("parallel", "parallel")

    out = pl.pallas_call(
        _intermediate_kernel,
        out_shape=jax.ShapeDtypeStruct((M, I), hidden_states.dtype),
        grid_spec=pltpu.PrefetchScalarGridSpec(
            num_scalar_prefetch=0,
            grid=grid,
            in_specs=in_specs,
            out_specs=out_specs,
        ),
        compiler_params=pltpu.CompilerParams(dimension_semantics=dim_sem),
        cost_estimate=cost,
    )(x, weight, b2)

    # Contiguous reshape only — no transpose pass through HBM.
    return out.reshape(B, S, I)


def _reference(hidden_states, weight, bias):
    y = hidden_states @ weight.T + bias
    return jax.nn.gelu(y.astype(jnp.float32),
                       approximate=False).astype(hidden_states.dtype)


if __name__ == "__main__":
    # Small shapes consistent with the module: hidden=32, intermediate=4*hidden.
    B, S, H = 2, 8, 32
    I = 4 * H  # 128

    key = jax.random.PRNGKey(0)
    k_x, k_w, k_b = jax.random.split(key, 3)

    hidden_states = jax.random.normal(k_x, (B, S, H), dtype=jnp.float32)

    # nn.Linear-style uniform init.
    bound = 1.0 / math.sqrt(H)
    weight = jax.random.uniform(k_w, (I, H), minval=-bound, maxval=bound,
                                dtype=jnp.float32)
    bias = jax.random.uniform(k_b, (I,), minval=-bound, maxval=bound,
                              dtype=jnp.float32)

    out = clap_text_intermediate(hidden_states, weight, bias)
    out = jax.block_until_ready(out)

    ref = _reference(hidden_states, weight, bias)

    assert out.shape == (B, S, I)
    assert jnp.allclose(out, ref, atol=1e-4, rtol=1e-4), (
        float(jnp.max(jnp.abs(out - ref))))

    print("KERNEL_OK")
</pallas_src>

<mosaic_0001>
module attributes {stable_mosaic.version = 11 : i64} {
  func.func @_intermediate_kernel(%arg0: i32, %arg1: memref<16x32xf32, #tpu.memory_space<vmem>>, %arg2: memref<128x32xf32, #tpu.memory_space<vmem>>, %arg3: memref<1x128xf32, #tpu.memory_space<vmem>>, %arg4: memref<16x128xf32, #tpu.memory_space<vmem>>) attributes {dimension_semantics = [#tpu.dimension_semantics<parallel>], iteration_bounds = array<i64: 1>, scalar_prefetch = 0 : i64, scratch_operands = 0 : i64, tpu.core_type = #tpu.core_type<tc>, window_params = [{transform_indices = @transform_0, window_bounds = array<i64: 16, 32>}, {pipeline_mode = #tpu.pipeline_mode<synchronous>, transform_indices = @transform_1, window_bounds = array<i64: 128, 32>}, {pipeline_mode = #tpu.pipeline_mode<synchronous>, transform_indices = @transform_2, window_bounds = array<i64: 1, 128>}, {transform_indices = @transform_3, window_bounds = array<i64: 16, 128>}]} {
    %c0 = arith.constant 0 : index
    %c0_0 = arith.constant 0 : index
    %0 = vector.load %arg1[%c0, %c0_0] : memref<16x32xf32, #tpu.memory_space<vmem>>, vector<16x32xf32>
    %c0_1 = arith.constant 0 : index
    %c0_2 = arith.constant 0 : index
    %1 = vector.load %arg2[%c0_1, %c0_2] : memref<128x32xf32, #tpu.memory_space<vmem>>, vector<128x32xf32>
    %cst = arith.constant dense<0.000000e+00> : vector<16x128xf32>
    %2 = tpu.matmul %0, %1, %cst {dimension_numbers = #tpu.dot_dimension_numbers<[1], [1], [0], [0], [0, 0, 1, 0], [], []>} : vector<16x32xf32>, vector<128x32xf32>, vector<16x128xf32> -> vector<16x128xf32>
    %c0_3 = arith.constant 0 : index
    %c0_4 = arith.constant 0 : index
    %3 = vector.load %arg3[%c0_3, %c0_4] : memref<1x128xf32, #tpu.memory_space<vmem>>, vector<1x128xf32>
    %4 = vector.broadcast %3 : vector<1x128xf32> to vector<16x128xf32>
    %5 = arith.addf %2, %4 : vector<16x128xf32>
    %cst_5 = arith.constant 5.000000e-01 : f32
    %6 = vector.broadcast %cst_5 : f32 to vector<16x128xf32>
    %7 = arith.mulf %6, %5 : vector<16x128xf32>
    %cst_6 = arith.constant 0.707106769 : f32
    %8 = vector.broadcast %cst_6 : f32 to vector<16x128xf32>
    %9 = arith.mulf %5, %8 : vector<16x128xf32>
    %10 = math.absf %9 : vector<16x128xf32>
    %cst_7 = arith.constant 0.327591091 : f32
    %11 = vector.broadcast %cst_7 : f32 to vector<16x128xf32>
    %12 = arith.mulf %11, %10 : vector<16x128xf32>
    %cst_8 = arith.constant 1.000000e+00 : f32
    %13 = vector.broadcast %cst_8 : f32 to vector<16x128xf32>
    %14 = arith.addf %13, %12 : vector<16x128xf32>
    %cst_9 = arith.constant 1.000000e+00 : f32
    %15 = vector.broadcast %cst_9 : f32 to vector<16x128xf32>
    %16 = arith.divf %15, %14 : vector<16x128xf32>
    %cst_10 = arith.constant 1.06140542 : f32
    %17 = vector.broadcast %cst_10 : f32 to vector<16x128xf32>
    %18 = arith.mulf %17, %16 : vector<16x128xf32>
    %cst_11 = arith.constant -1.45315206 : f32
    %19 = vector.broadcast %cst_11 : f32 to vector<16x128xf32>
    %20 = arith.addf %18, %19 : vector<16x128xf32>
    %21 = arith.mulf %20, %16 : vector<16x128xf32>
    %cst_12 = arith.constant 1.42141378 : f32
    %22 = vector.broadcast %cst_12 : f32 to vector<16x128xf32>
    %23 = arith.addf %21, %22 : vector<16x128xf32>
    %24 = arith.mulf %23, %16 : vector<16x128xf32>
    %cst_13 = arith.constant -0.284496725 : f32
    %25 = vector.broadcast %cst_13 : f32 to vector<16x128xf32>
    %26 = arith.addf %24, %25 : vector<16x128xf32>
    %27 = arith.mulf %26, %16 : vector<16x128xf32>
    %cst_14 = arith.constant 0.254829586 : f32
    %28 = vector.broadcast %cst_14 : f32 to vector<16x128xf32>
    %29 = arith.addf %27, %28 : vector<16x128xf32>
    %30 = arith.mulf %29, %16 : vector<16x128xf32>
    %31 = arith.mulf %10, %10 : vector<16x128xf32>
    %cst_15 = arith.constant 0.000000e+00 : f32
    %32 = vector.broadcast %cst_15 : f32 to vector<16x128xf32>
    %33 = arith.subf %32, %31 : vector<16x128xf32>
    %34 = math.exp %33 : vector<16x128xf32>
    %35 = arith.mulf %30, %34 : vector<16x128xf32>
    %cst_16 = arith.constant 1.000000e+00 : f32
    %36 = vector.broadcast %cst_16 : f32 to vector<16x128xf32>
    %37 = arith.subf %36, %35 : vector<16x128xf32>
    %cst_17 = arith.constant 0.000000e+00 : f32
    %38 = vector.broadcast %cst_17 : f32 to vector<16x128xf32>
    %39 = arith.cmpf oge, %9, %38 : vector<16x128xf32>
    %cst_18 = arith.constant 0.000000e+00 : f32
    %40 = vector.broadcast %cst_18 : f32 to vector<16x128xf32>
    %41 = arith.subf %40, %37 : vector<16x128xf32>
    %42 = arith.select %39, %37, %41 : vector<16x128xi1>, vector<16x128xf32>
    %cst_19 = arith.constant 1.000000e+00 : f32
    %43 = vector.broadcast %cst_19 : f32 to vector<16x128xf32>
    %44 = arith.addf %43, %42 : vector<16x128xf32>
    %45 = arith.mulf %7, %44 : vector<16x128xf32>
    %c0_20 = arith.constant 0 : index
    %c0_21 = arith.constant 0 : index
    %46 = vector.load %arg4[%c0_20, %c0_21] : memref<16x128xf32, #tpu.memory_space<vmem>>, vector<16x128xf32>
    tpu.vector_store %arg4[%c0_20, %c0_21], %45 {strides = array<i32>} : memref<16x128xf32, #tpu.memory_space<vmem>>, vector<16x128xf32>,
    return
  }
  func.func @transform_0(%arg0: i32) -> (i32, i32) {
    %c0_i32 = arith.constant 0 : i32
    %c0_i32_0 = arith.constant 0 : i32
    return %arg0, %c0_i32 : i32, i32
  }
  func.func @transform_1(%arg0: i32) -> (i32, i32) {
    %c0_i32 = arith.constant 0 : i32
    %c0_i32_0 = arith.constant 0 : i32
    %c0_i32_1 = arith.constant 0 : i32
    return %c0_i32, %c0_i32_0 : i32, i32
  }
  func.func @transform_2(%arg0: i32) -> (i32, i32) {
    %c0_i32 = arith.constant 0 : i32
    %c0_i32_0 = arith.constant 0 : i32
    %c0_i32_1 = arith.constant 0 : i32
    return %c0_i32, %c0_i32_0 : i32, i32
  }
  func.func @transform_3(%arg0: i32) -> (i32, i32) {
    %c0_i32 = arith.constant 0 : i32
    %c0_i32_0 = arith.constant 0 : i32
    return %arg0, %c0_i32 : i32, i32
  }
}

</mosaic_0001>

<bundles_post_ra>
// kernel: tpu_custom_call.1
= control target key start
LH: loop header
LB: loop body
LE: loop exit
PB: predicated region body
PF: predicated region fallthrough
CT: control target
= control target key end

     0   :  { %vm40_vm0 = vcmask 261120   ;;  %s529_s0 = inlined_call_operand.vmem [shape: f32[16,32], index: 0, kind: input, shape index: {}]   ;;  %s530_s1 = inlined_call_operand.vmem [shape: f32[128,32], index: 1, kind: input, shape index: {}]   ;;  %s531_s2 = inlined_call_operand.vmem [shape: f32[1,128], index: 2, kind: input, shape index: {}]   ;;  %s532_s3 = inlined_call_operand.hbm [shape: f32[16,128], index: 3, kind: output, shape index: {}]  }
   0x1   :  { %v17_v0 = vld [vmem:[%s530_s1] sm:$0xff]  ;;  %v18_v1 = vld [vmem:[%s530_s1 + $0x8] sm:$0xff]  ;;  %v19_v2 = vld [vmem:[%s530_s1 + $0x10] sm:$0xff] }
   0x2   :  { %v314_v3 = vpack.c.bf16 %v18_v1, %v17_v0  ;;  %vm431_vm1 = vmpackc.low %vm40_vm0, %vm40_vm0  ;;  %v20_v5 = vld [vmem:[%s530_s1 + $0x18] sm:$0xff]  ;;  %v15_v7 = vld [vmem:[%s529_s0] sm:$0xff] }
   0x3   :  { %v320_v6 = vpack.c.bf16 %v20_v5, %v19_v2  ;;  %v21_v8 = vld [vmem:[%s530_s1 + $0x20] sm:$0xff]  ;;  %v22_v9 = vld [vmem:[%s530_s1 + $0x28] sm:$0xff]  ;;  %311 = vmatprep.mubr.msk.f32.mxu0 %vm40_vm0, %v15_v7 }
   0x4   :  { %316 = vmatprep.subr.msk.bf16.mxu0 %vm431_vm1, %v314_v3 }
   0x5   :  { %319 = vmatpush3.bf16.xpose.msk.msra.mxu0 %vm431_vm1, %v314_v3 }
   0x6   :  { %322 = vmatprep.subr.msk.bf16.mxu0 %vm431_vm1, %v320_v6 }
   0x7   :  { %8 = vsyncpa [#allocation3], 0  ;;  %v326_v10 = vpack.c.bf16 %v22_v9, %v21_v8  ;;  %v23_v11 = vld [vmem:[%s530_s1 + $0x30] sm:$0xff]  ;;  %v24_v12 = vld [vmem:[%s530_s1 + $0x38] sm:$0xff] }
   0x8   :  { %v332_v13 = vpack.c.bf16 %v24_v12, %v23_v11  ;;  %v25_v14 = vld [vmem:[%s530_s1 + $0x40] sm:$0xff]  ;;  %v26_v15 = vld [vmem:[%s530_s1 + $0x48] sm:$0xff]  ;;  %v27_v17 = vld [vmem:[%s530_s1 + $0x50] sm:$0xff] }
   0x9   :  { %v338_v16 = vpack.c.bf16 %v26_v15, %v25_v14  ;;  %v28_v18 = vld [vmem:[%s530_s1 + $0x58] sm:$0xff]  ;;  %v29_v20 = vld [vmem:[%s530_s1 + $0x60] sm:$0xff]  ;;  %v30_v21 = vld [vmem:[%s530_s1 + $0x68] sm:$0xff] }
   0xa   :  { %v344_v19 = vpack.c.bf16 %v28_v18, %v27_v17  ;;  %v350_v22 = vpack.c.bf16 %v30_v21, %v29_v20  ;;  %v31_v23 = vld [vmem:[%s530_s1 + $0x70] sm:$0xff]  ;;  %v32_v24 = vld [vmem:[%s530_s1 + $0x78] sm:$0xff]  ;;  %v16_v26 = vld [vmem:[%s529_s0 + $0x8] sm:$0xff]  ;;  %s397_s0 = smov [#allocation2]  }
   0xb   :  { %v356_v25 = vpack.c.bf16 %v32_v24, %v31_v23  ;;  %v242_v27 = vld [vmem:[%s531_s2] ss:$0 sm:$0xff]  ;;  %s231_s1 = sshll.u32 %s397_s0, 4  ;;  %s232_s1 = int_to_ptr.vmem [resolvable:$true] %s231_s1 }
   0xc   :  { %s373_s2 = scalar_lea.vmem %s232_s1, 256  ;;  %p378_p1 = scmp.lt.s32.totalorder %s232_s1, %s232_s1 }
   0xd   :  { %325 = vmatpush3.bf16.xpose.msk.msra.mxu0 %vm431_vm1, %v320_v6  ;;  %p374_p0 = scmp.ne.s32.totalorder %s232_s1, %s373_s2  ;;  %p379_p2 = scmp.lt.s32.totalorder %s373_s2, %s373_s2 }
   0xe   :  { %328 = vmatprep.subr.msk.bf16.mxu0 %vm431_vm1, %v326_v10 }
   0xf   :  { %p380_p3 = por %p379_p2, %p378_p1 }
  0x11   :  { %p381_p4 = pnand %p380_p3, %p374_p0 }
  0x15   :  { %331 = vmatpush3.bf16.xpose.msk.msra.mxu0 %vm431_vm1, %v326_v10 }
  0x16   :  { %334 = vmatprep.subr.msk.bf16.mxu0 %vm431_vm1, %v332_v13 }
  0x1d   :  { %337 = vmatpush3.bf16.xpose.msk.msra.mxu0 %vm431_vm1, %v332_v13 }
  0x1e   :  { %340 = vmatprep.subr.msk.bf16.mxu0 %vm431_vm1, %v338_v16 }
  0x25   :  { %343 = vmatpush3.bf16.xpose.msk.msra.mxu0 %vm431_vm1, %v338_v16 }
  0x26   :  { %346 = vmatprep.subr.msk.bf16.mxu0 %vm431_vm1, %v344_v19 }
  0x2d   :  { %349 = vmatpush3.bf16.xpose.msk.msra.mxu0 %vm431_vm1, %v344_v19 }
  0x2e   :  { %352 = vmatprep.subr.msk.bf16.mxu0 %vm431_vm1, %v350_v22 }
  0x35   :  { %355 = vmatpush3.bf16.xpose.msk.msra.mxu0 %vm431_vm1, %v350_v22 }
  0x36   :  { %358 = vmatprep.subr.msk.bf16.mxu0 %vm431_vm1, %v356_v25 }
  0x3d   :  { %361 = vmatpush3.bf16.xpose.msk.msra.mxu0 %vm431_vm1, %v356_v25 }
  0x44   :  { %312 = vmatmul.mubr.msk.f32.vlgmr.msra.gmra.mrb[0].mxu0 %vm40_vm0, %v16_v26 }
 0x117   :  { %v313_v28 = vpop.f32.mrb[0].mxu0 }
 0x118   :  { %v167_v29 = vadd.f32 %v313_v28, %v242_v27  ;;  %v161_v30 = vpop.f32.mrb[1].mxu0 }
 0x119   :  { %v162_v31 = vadd.f32 %v242_v27, %v161_v30 }
 0x11a   :  { %v173_v32 = vmul.f32 0.70710677, %v167_v29  ;;  %v171_v11 = vmul.f32 0.5, %v167_v29 }
 0x11b   :  { %v172_v33 = vmul.f32 0.70710677, %v162_v31  ;;  %v170_v14 = vmul.f32 0.5, %v162_v31 }
 0x11c   :  { %v175_v34 = vand.u32 2147483647, %v173_v32  ;;  %vm215_vm2 = vcmp.ge.f32.partialorder %v173_v32, 0.0 }
 0x11d   :  { %v174_v35 = vand.u32 2147483647, %v172_v33  ;;  %vm214_vm3 = vcmp.ge.f32.partialorder %v172_v33, 0.0 }
 0x11e   :  { %v177_v36 = vmul.f32 0.3275911, %v175_v34  ;;  %v203_v40 = vmul.f32 %v175_v34, %v175_v34 }
 0x11f   :  { %v176_v37 = vmul.f32 0.3275911, %v174_v35  ;;  %v202_v41 = vmul.f32 %v174_v35, %v174_v35 }
 0x120   :  { %v179_v38 = vadd.f32 1.0, %v177_v36  ;;  %v205_v43 = vsub.f32 0.0, %v203_v40 }
 0x121   :  { %v178_v39 = vadd.f32 1.0, %v176_v37  ;;  %v204_v46 = vsub.f32 0.0, %v202_v41 }
 0x122   :  { %365 = vrcp.f32 %v179_v38  ;;  %v208_v49 = vmul.f32 1.442695, %v205_v43 }
 0x123   :  { %367 = vrcp.f32 %v178_v39  ;;  %v206_v52 = vmul.f32 1.442695, %v204_v46 }
 0x124   :  { %369 = vpow2.f32 %v208_v49 }
 0x125   :  { %371 = vpow2.f32 %v206_v52 }
 0x12c   :  { %v366_v42 = vpop.eup %365 }
 0x12d   :  { %v368_v44 = vpop.eup %367  ;;  %v185_v45 = vmul.f32 1.0614054, %v366_v42 }
 0x12e   :  { %v184_v47 = vmul.f32 1.0614054, %v368_v44  ;;  %v370_v1 = vpop.eup %369 }
 0x12f   :  { %v187_v48 = vadd.f32 -1.4531521, %v185_v45  ;;  %v372_v3 = vpop.eup %371 }
 0x130   :  { %v186_v50 = vadd.f32 -1.4531521, %v184_v47 }
 0x131   :  { %v189_v51 = vmul.f32 %v366_v42, %v187_v48 }
 0x132   :  { %v188_v53 = vmul.f32 %v368_v44, %v186_v50 }
 0x133   :  { %v191_v54 = vadd.f32 1.4214138, %v189_v51 }
 0x134   :  { %v190_v55 = vadd.f32 1.4214138, %v188_v53 }
 0x135   :  { %v193_v56 = vmul.f32 %v366_v42, %v191_v54 }
 0x136   :  { %v192_v57 = vmul.f32 %v368_v44, %v190_v55 }
 0x137   :  { %v195_v58 = vadd.f32 -0.28449672, %v193_v56 }
 0x138   :  { %v194_v59 = vadd.f32 -0.28449672, %v192_v57 }
 0x139   :  { %v197_v60 = vmul.f32 %v366_v42, %v195_v58 }
 0x13a   :  { %v196_v61 = vmul.f32 %v368_v44, %v194_v59 }
 0x13b   :  { %v199_v62 = vadd.f32 0.2548296, %v197_v60 }
 0x13c   :  { %v198_v63 = vadd.f32 0.2548296, %v196_v61 }
 0x13d   :  { %v201_v0 = vmul.f32 %v366_v42, %v199_v62 }
 0x13e   :  { %v200_v2 = vmul.f32 %v368_v44, %v198_v63 }
 0x13f   :  { %v211_v4 = vmul.f32 %v370_v1, %v201_v0 }
 0x140   :  { %v210_v5 = vmul.f32 %v372_v3, %v200_v2 }
 0x141   :  { %v213_v6 = vsub.f32 1.0, %v211_v4 }
 0x142   :  { %v212_v7 = vsub.f32 1.0, %v210_v5 }
 0x143   :  { %v217_v8 = vsub.f32 0.0, %v213_v6 }
 0x144   :  { %v216_v9 = vsub.f32 0.0, %v212_v7 }
 0x145   :  { %v219_v10 = vsel %vm215_vm2, %v213_v6, %v217_v8 }
 0x146   :  { %v221_v12 = vadd.f32 1.0, %v219_v10  ;;  %v218_v13 = vsel %vm214_vm3, %v212_v7, %v216_v9 }
 0x147   :  { %v220_v15 = vadd.f32 1.0, %v218_v13 }
 0x148   :  { %v223_v16 = vmul.f32 %v221_v12, %v171_v11 }
 0x149   :  { %v222_v17 = vmul.f32 %v220_v15, %v170_v14 }
 0x14a   :  { %225 = vst [vmem:[#allocation2 + $0x8] sm:$0xff] %v223_v16 }
 0x14b   :  { %224 = vst [vmem:[#allocation2] sm:$0xff] %v222_v17 }
 0x14c   :  { %384 = shalt.err (!%p381_p4)
}
 0x14d   :  { %s385_s25 = scalar_lea.hbm %s532_s3, 256 }
 0x14e   :  { %p386_p5 = scmp.ne.s32.totalorder %s532_s3, %s385_s25  ;;  %p389_p6 = scmp.lt.u32.totalorder %s385_s25, %s532_s3 }
 0x150   :  { %p391_p7 = pnand %p389_p6, %p386_p5 }
 0x152   :  { %394 = shalt.err (!%p391_p7)
}
 0x153   :  { %s398_s30 = smov 128   ;;  %s399_s4 = smov 8  }
 0x154   :  { %237 = dma.vmem_to_hbm [thread:$0]  %s232_s1, 256, %s532_s3, [#allocation3], %s398_s30, %s398_s30, %s399_s4  }
 0x155   :  { %395 = dma.done.wait [#allocation3], 256  }
 0x156   :  { %396 = vsyncadd [#allocation3], 4294967040 }
 0x157   :  { %241 = vsyncpa [#allocation3], 1 }

</bundles_post_ra>
